<compile_context>
chip_gen: v7x
topology: tpu7x:2x2x1
jax: 0.10.0
libtpu: 0.0.40
codegen_flags: <defaults>
</compile_context>

<pallas_src>
from functools import partial

import jax
import jax.numpy as jnp
from jax.experimental import pallas as pl
from jax.experimental.pallas import tpu as pltpu

OBS_SIZE = 16
HIDDEN = 50
N_ACTIONS = 4
BATCH = 8

LANE = 128        # pad every feature dim to one full vreg lane width
N_LAYERS = 4


# --------------------------------------------------------------------------- #
# Kernel bodies
# --------------------------------------------------------------------------- #
def _mlp_body(x_ref, w_ref, b_ref):
    """Fused 4-layer MLP on one [TM, OBS_SIZE] batch tile -> (TM, 128) f32 q-slab.

    x_ref : (TM, OBS_SIZE)   f32   raw observations (cast to bf16 in-kernel)
    w_ref : (4, 128, 128)    bf16  packed, zero-padded weights [in, out]
    b_ref : (4, 1, 128)      f32   packed, zero-padded biases
    """
    h = x_ref[...].astype(jnp.bfloat16)                       # (TM, 16) bf16 MXU operand
    # Layer 1: contract only the real OBS_SIZE rows of the padded weight slab.
    a = jnp.dot(h, w_ref[0, :OBS_SIZE, :], preferred_element_type=jnp.float32)
    a = a + b_ref[0]
    h = jnp.maximum(a, 0.0).astype(jnp.bfloat16)
    # Hidden layers 2, 2_2.
    for layer in range(1, N_LAYERS - 1):
        a = jnp.dot(h, w_ref[layer], preferred_element_type=jnp.float32)
        a = a + b_ref[layer]                                  # bias + ReLU in f32 (VPU)
        h = jnp.maximum(a, 0.0).astype(jnp.bfloat16)
    # Output layer (no ReLU).
    q = jnp.dot(h, w_ref[N_LAYERS - 1], preferred_element_type=jnp.float32)
    return q + b_ref[N_LAYERS - 1]                            # (TM, 128) f32


def qfunction_kernel(x_ref, w_ref, b_ref, out_ref):
    """Training / q-value path: store the full (lane-dense) q slab."""
    out_ref[...] = _mlp_body(x_ref, w_ref, b_ref).astype(out_ref.dtype)


def qfunction_greedy_kernel(x_ref, w_ref, b_ref, out_ref):
    """Act path: fuse the DiscreteActionValue epilogue (max / greedy argmax).

    Output slab (TM, 128) f32: lane 0 = max_a q(s,a), lane 1 = argmax_a q(s,a).
    """
    q = _mlp_body(x_ref, w_ref, b_ref)                        # (TM, 128) f32
    lane = jax.lax.broadcasted_iota(jnp.int32, q.shape, 1)
    valid = lane < N_ACTIONS
    qm = jnp.where(valid, q, -jnp.inf)
    max_q = jnp.max(qm, axis=-1, keepdims=True)               # (TM, 1)
    is_max = jnp.logical_and(qm == max_q, valid)
    greedy = jnp.min(jnp.where(is_max, lane, LANE), axis=-1, keepdims=True)  # first argmax
    out = jnp.where(lane == 0, max_q, 0.0)
    out = jnp.where(lane == 1, greedy.astype(jnp.float32), out)
    out_ref[...] = out                                        # lane-dense 128-wide store


# --------------------------------------------------------------------------- #
# Tiling policy
# --------------------------------------------------------------------------- #
def _round_up(n, m):
    return ((n + m - 1) // m) * m


def _choose_tm(batch, tm_cap):
    """Batch-tile rows: multiple of 16 (bf16 sublane packing)."""
    rb = _round_up(max(batch, 1), 16)
    if rb <= 512:
        return rb                                  # tiny batch: one tile, no grid overhead
    if rb <= 2 * tm_cap:
        return _round_up((rb + 1) // 2, 16)        # even 2-tile grid -> both TCs on v7x
    return tm_cap                                  # large batch: big tiles amortize ~0.35us/step


def _pallas_mlp_call(kernel, x, w_packed, b_packed, tm_cap):
    batch, obs = x.shape
    assert obs == OBS_SIZE, f"expected obs dim {OBS_SIZE}, got {obs}"
    tm = _choose_tm(batch, tm_cap)
    grid_m = (batch + tm - 1) // tm
    batch_pad = grid_m * tm
    xp = x if batch_pad == batch else jnp.pad(x, ((0, batch_pad - batch), (0, 0)))

    out_pad = pl.pallas_call(
        kernel,
        out_shape=jax.ShapeDtypeStruct((batch_pad, LANE), jnp.float32),
        grid=(grid_m,),
        in_specs=[
            pl.BlockSpec((tm, OBS_SIZE), lambda i: (i, 0)),                 # x tiles over batch
            pl.BlockSpec((N_LAYERS, LANE, LANE), lambda i: (0, 0, 0)),      # weights resident
            pl.BlockSpec((N_LAYERS, 1, LANE), lambda i: (0, 0, 0)),         # biases resident
        ],
        out_specs=pl.BlockSpec((tm, LANE), lambda i: (i, 0)),
        compiler_params=pltpu.CompilerParams(
            dimension_semantics=("parallel",),   # shard batch tiles across TCs on v7x
        ),
    )(xp, w_packed, b_packed)
    return out_pad


# --------------------------------------------------------------------------- #
# Public wrappers (single-dispatch under jit)
# --------------------------------------------------------------------------- #
@partial(jax.jit, static_argnames=("n_actions", "tm_cap"))
def qfunction_forward(x, w_packed, b_packed, n_actions=N_ACTIONS, tm_cap=1024):
    """x: [batch, OBS_SIZE] f32 -> q: [batch, n_actions] f32."""
    batch = x.shape[0]
    q_pad = _pallas_mlp_call(qfunction_kernel, x, w_packed, b_packed, tm_cap)
    return q_pad[:batch, :n_actions]


@partial(jax.jit, static_argnames=("tm_cap",))
def qfunction_greedy(x, w_packed, b_packed, tm_cap=1024):
    """Fused act path: x -> (greedy_actions int32 [batch], max_q f32 [batch])."""
    batch = x.shape[0]
    out_pad = _pallas_mlp_call(qfunction_greedy_kernel, x, w_packed, b_packed, tm_cap)
    max_q = out_pad[:batch, 0]
    greedy = out_pad[:batch, 1].astype(jnp.int32)
    return greedy, max_q
    # TODO(synk): pfrl.action_value.DiscreteActionValue is a Python wrapper object;
    # its greedy_actions/max are produced here, the wrapper itself stays host-side.


# --------------------------------------------------------------------------- #
# Params: logical init (torch.nn.Linear-style) + lane-dense packing
# --------------------------------------------------------------------------- #
def init_params(key, obs_size, n_actions, hidden=HIDDEN):
    """Uniform +-1/sqrt(fan_in), weights stored logically as [in, out]."""
    def linear(k, fan_in, fan_out):
        kw, kb = jax.random.split(k)
        bound = 1.0 / jnp.sqrt(jnp.float32(fan_in))
        w = jax.random.uniform(kw, (fan_in, fan_out), jnp.float32, -bound, bound)
        b = jax.random.uniform(kb, (fan_out,), jnp.float32, -bound, bound)
        return w, b

    k1, k2, k3, k4 = jax.random.split(key, 4)
    return (
        linear(k1, obs_size, hidden),   # l1
        linear(k2, hidden, hidden),     # l2
        linear(k3, hidden, hidden),     # l2_2
        linear(k4, hidden, n_actions),  # l3
    )


def pack_params(params):
    """Pack the 4 (w, b) pairs into single zero-padded 128-lane slabs.

    Zero padding is exact: padded weight rows/cols and bias lanes are 0, so
    relu(0 + 0) = 0 and padded lanes never contaminate later layers.
    """
    w_packed = jnp.zeros((N_LAYERS, LANE, LANE), jnp.float32)
    b_packed = jnp.zeros((N_LAYERS, 1, LANE), jnp.float32)
    for layer, (w, b) in enumerate(params):
        fi, fo = w.shape
        w_packed = w_packed.at[layer, :fi, :fo].set(w)
        b_packed = b_packed.at[layer, 0, :fo].set(b)
    return w_packed.astype(jnp.bfloat16), b_packed  # bf16 MXU operands, f32 biases


# --------------------------------------------------------------------------- #
# References
# --------------------------------------------------------------------------- #
def reference_forward_f32(x, params):
    (w1, b1), (w2, b2), (w22, b22), (w3, b3) = params
    h = jnp.maximum(x @ w1 + b1, 0.0)
    h = jnp.maximum(h @ w2 + b2, 0.0)
    h = jnp.maximum(h @ w22 + b22, 0.0)
    return h @ w3 + b3


def reference_forward_bf16(x, params):
    """Mirrors the kernel's numerics: bf16 matmul operands, f32 accumulate/bias/ReLU."""
    h = x.astype(jnp.bfloat16)
    for i, (w, b) in enumerate(params):
        a = jnp.dot(h, w.astype(jnp.bfloat16), preferred_element_type=jnp.float32) + b
        if i < len(params) - 1:
            h = jnp.maximum(a, 0.0).astype(jnp.bfloat16)
        else:
            h = a
    return h


# --------------------------------------------------------------------------- #
if __name__ == "__main__":
    key = jax.random.PRNGKey(0)
    kx, kp = jax.random.split(key)

    x = jax.random.normal(kx, (BATCH, OBS_SIZE), dtype=jnp.float32)
    params = init_params(kp, OBS_SIZE, N_ACTIONS)
    w_packed, b_packed = pack_params(params)

    # Q-value path (forward semantics).
    q = qfunction_forward(x, w_packed, b_packed)
    q = jax.block_until_ready(q)
    assert q.shape == (BATCH, N_ACTIONS)

    # Tight check vs a reference with matching bf16/f32 numerics.
    q_bf16 = reference_forward_bf16(x, params)
    assert jnp.allclose(q, q_bf16, atol=1e-3, rtol=1e-3), "mismatch vs bf16 reference"

    # Loose check vs the full-f32 torch-equivalent math (bf16 quantization error only).
    q_f32 = reference_forward_f32(x, params)
    assert jnp.allclose(q, q_f32, atol=5e-2, rtol=5e-2), "mismatch vs f32 reference"

    # Fused act path (DiscreteActionValue epilogue on-chip).
    greedy, max_q = qfunction_greedy(x, w_packed, b_packed)
    greedy = jax.block_until_ready(greedy)
    max_q = jax.block_until_ready(max_q)
    assert greedy.shape == (BATCH,) and max_q.shape == (BATCH,)
    assert jnp.allclose(max_q, jnp.max(q, axis=-1), atol=1e-3, rtol=1e-3), "max_q mismatch"
    q_at_greedy = jnp.take_along_axis(q, greedy[:, None], axis=1)[:, 0]
    assert jnp.all(q_at_greedy >= jnp.max(q, axis=-1) - 1e-3), "greedy action not maximal"

    print("KERNEL_OK")
</pallas_src>

<mosaic_0001>
module attributes {stable_mosaic.version = 11 : i64} {
  func.func @qfunction_kernel(%arg0: i32, %arg1: memref<16x16xf32, #tpu.memory_space<vmem>>, %arg2: memref<4x128x128xbf16, #tpu.memory_space<vmem>>, %arg3: memref<4x1x128xf32, #tpu.memory_space<vmem>>, %arg4: memref<16x128xf32, #tpu.memory_space<vmem>>) attributes {dimension_semantics = [#tpu.dimension_semantics<parallel>], iteration_bounds = array<i64: 1>, scalar_prefetch = 0 : i64, scratch_operands = 0 : i64, tpu.core_type = #tpu.core_type<tc>, window_params = [{transform_indices = @transform_0, window_bounds = array<i64: 16, 16>}, {pipeline_mode = #tpu.pipeline_mode<synchronous>, transform_indices = @transform_1, window_bounds = array<i64: 4, 128, 128>}, {pipeline_mode = #tpu.pipeline_mode<synchronous>, transform_indices = @transform_2, window_bounds = array<i64: 4, 1, 128>}, {transform_indices = @transform_3, window_bounds = array<i64: 16, 128>}]} {
    %c0 = arith.constant 0 : index
    %c0_0 = arith.constant 0 : index
    %0 = vector.load %arg1[%c0, %c0_0] : memref<16x16xf32, #tpu.memory_space<vmem>>, vector<16x16xf32>
    %1 = arith.truncf %0 : vector<16x16xf32> to vector<16x16xbf16>
    %c0_1 = arith.constant 0 : index
    %c0_2 = arith.constant 0 : index
    %c0_3 = arith.constant 0 : index
    %2 = vector.load %arg2[%c0_1, %c0_2, %c0_3] : memref<4x128x128xbf16, #tpu.memory_space<vmem>>, vector<1x16x128xbf16>
    %3 = vector.shape_cast %2 : vector<1x16x128xbf16> to vector<16x128xbf16>
    %cst = arith.constant dense<0.000000e+00> : vector<16x128xf32>
    %4 = tpu.matmul %1, %3, %cst {dimension_numbers = #tpu.dot_dimension_numbers<[1], [0], [0], [1], [0, 0, 1, 1], [], []>} : vector<16x16xbf16>, vector<16x128xbf16>, vector<16x128xf32> -> vector<16x128xf32>
    %c0_4 = arith.constant 0 : index
    %c0_5 = arith.constant 0 : index
    %c0_6 = arith.constant 0 : index
    %5 = vector.load %arg3[%c0_4, %c0_5, %c0_6] : memref<4x1x128xf32, #tpu.memory_space<vmem>>, vector<1x1x128xf32>
    %6 = vector.shape_cast %5 : vector<1x1x128xf32> to vector<1x128xf32>
    %7 = vector.broadcast %6 : vector<1x128xf32> to vector<16x128xf32>
    %8 = arith.addf %4, %7 : vector<16x128xf32>
    %cst_7 = arith.constant 0.000000e+00 : f32
    %9 = vector.broadcast %cst_7 : f32 to vector<16x128xf32>
    %10 = arith.maximumf %8, %9 : vector<16x128xf32>
    %11 = arith.truncf %10 : vector<16x128xf32> to vector<16x128xbf16>
    %c1 = arith.constant 1 : index
    %c0_8 = arith.constant 0 : index
    %c0_9 = arith.constant 0 : index
    %12 = vector.load %arg2[%c1, %c0_8, %c0_9] : memref<4x128x128xbf16, #tpu.memory_space<vmem>>, vector<1x128x128xbf16>
    %13 = vector.shape_cast %12 : vector<1x128x128xbf16> to vector<128x128xbf16>
    %cst_10 = arith.constant dense<0.000000e+00> : vector<16x128xf32>
    %14 = tpu.matmul %11, %13, %cst_10 {dimension_numbers = #tpu.dot_dimension_numbers<[1], [0], [0], [1], [0, 0, 1, 1], [], []>} : vector<16x128xbf16>, vector<128x128xbf16>, vector<16x128xf32> -> vector<16x128xf32>
    %c1_11 = arith.constant 1 : index
    %c0_12 = arith.constant 0 : index
    %c0_13 = arith.constant 0 : index
    %15 = vector.load %arg3[%c1_11, %c0_12, %c0_13] : memref<4x1x128xf32, #tpu.memory_space<vmem>>, vector<1x1x128xf32>
    %16 = vector.shape_cast %15 : vector<1x1x128xf32> to vector<1x128xf32>
    %17 = vector.broadcast %16 : vector<1x128xf32> to vector<16x128xf32>
    %18 = arith.addf %14, %17 : vector<16x128xf32>
    %cst_14 = arith.constant 0.000000e+00 : f32
    %19 = vector.broadcast %cst_14 : f32 to vector<16x128xf32>
    %20 = arith.maximumf %18, %19 : vector<16x128xf32>
    %21 = arith.truncf %20 : vector<16x128xf32> to vector<16x128xbf16>
    %c2 = arith.constant 2 : index
    %c0_15 = arith.constant 0 : index
    %c0_16 = arith.constant 0 : index
    %22 = vector.load %arg2[%c2, %c0_15, %c0_16] : memref<4x128x128xbf16, #tpu.memory_space<vmem>>, vector<1x128x128xbf16>
    %23 = vector.shape_cast %22 : vector<1x128x128xbf16> to vector<128x128xbf16>
    %cst_17 = arith.constant dense<0.000000e+00> : vector<16x128xf32>
    %24 = tpu.matmul %21, %23, %cst_17 {dimension_numbers = #tpu.dot_dimension_numbers<[1], [0], [0], [1], [0, 0, 1, 1], [], []>} : vector<16x128xbf16>, vector<128x128xbf16>, vector<16x128xf32> -> vector<16x128xf32>
    %c2_18 = arith.constant 2 : index
    %c0_19 = arith.constant 0 : index
    %c0_20 = arith.constant 0 : index
    %25 = vector.load %arg3[%c2_18, %c0_19, %c0_20] : memref<4x1x128xf32, #tpu.memory_space<vmem>>, vector<1x1x128xf32>
    %26 = vector.shape_cast %25 : vector<1x1x128xf32> to vector<1x128xf32>
    %27 = vector.broadcast %26 : vector<1x128xf32> to vector<16x128xf32>
    %28 = arith.addf %24, %27 : vector<16x128xf32>
    %cst_21 = arith.constant 0.000000e+00 : f32
    %29 = vector.broadcast %cst_21 : f32 to vector<16x128xf32>
    %30 = arith.maximumf %28, %29 : vector<16x128xf32>
    %31 = arith.truncf %30 : vector<16x128xf32> to vector<16x128xbf16>
    %c3 = arith.constant 3 : index
    %c0_22 = arith.constant 0 : index
    %c0_23 = arith.constant 0 : index
    %32 = vector.load %arg2[%c3, %c0_22, %c0_23] : memref<4x128x128xbf16, #tpu.memory_space<vmem>>, vector<1x128x128xbf16>
    %33 = vector.shape_cast %32 : vector<1x128x128xbf16> to vector<128x128xbf16>
    %cst_24 = arith.constant dense<0.000000e+00> : vector<16x128xf32>
    %34 = tpu.matmul %31, %33, %cst_24 {dimension_numbers = #tpu.dot_dimension_numbers<[1], [0], [0], [1], [0, 0, 1, 1], [], []>} : vector<16x128xbf16>, vector<128x128xbf16>, vector<16x128xf32> -> vector<16x128xf32>
    %c3_25 = arith.constant 3 : index
    %c0_26 = arith.constant 0 : index
    %c0_27 = arith.constant 0 : index
    %35 = vector.load %arg3[%c3_25, %c0_26, %c0_27] : memref<4x1x128xf32, #tpu.memory_space<vmem>>, vector<1x1x128xf32>
    %36 = vector.shape_cast %35 : vector<1x1x128xf32> to vector<1x128xf32>
    %37 = vector.broadcast %36 : vector<1x128xf32> to vector<16x128xf32>
    %38 = arith.addf %34, %37 : vector<16x128xf32>
    %c0_28 = arith.constant 0 : index
    %c0_29 = arith.constant 0 : index
    %39 = vector.load %arg4[%c0_28, %c0_29] : memref<16x128xf32, #tpu.memory_space<vmem>>, vector<16x128xf32>
    tpu.vector_store %arg4[%c0_28, %c0_29], %38 {strides = array<i32>} : memref<16x128xf32, #tpu.memory_space<vmem>>, vector<16x128xf32>,
    return
  }
  func.func @transform_0(%arg0: i32) -> (i32, i32) {
    %c0_i32 = arith.constant 0 : i32
    %c0_i32_0 = arith.constant 0 : i32
    return %arg0, %c0_i32 : i32, i32
  }
  func.func @transform_1(%arg0: i32) -> (i32, i32, i32) {
    %c0_i32 = arith.constant 0 : i32
    %c0_i32_0 = arith.constant 0 : i32
    %c0_i32_1 = arith.constant 0 : i32
    %c0_i32_2 = arith.constant 0 : i32
    return %c0_i32, %c0_i32_0, %c0_i32_1 : i32, i32, i32
  }
  func.func @transform_2(%arg0: i32) -> (i32, i32, i32) {
    %c0_i32 = arith.constant 0 : i32
    %c0_i32_0 = arith.constant 0 : i32
    %c0_i32_1 = arith.constant 0 : i32
    %c0_i32_2 = arith.constant 0 : i32
    return %c0_i32, %c0_i32_0, %c0_i32_1 : i32, i32, i32
  }
  func.func @transform_3(%arg0: i32) -> (i32, i32) {
    %c0_i32 = arith.constant 0 : i32
    %c0_i32_0 = arith.constant 0 : i32
    return %arg0, %c0_i32 : i32, i32
  }
}

</mosaic_0001>

<bundles_post_ra>
// kernel: qfunction_forward.1
= control target key start
LH: loop header
LB: loop body
LE: loop exit
PB: predicated region body
PF: predicated region fallthrough
CT: control target
= control target key end

     0   :  { %8 = vsyncpa [#allocation3], 0  ;;  %s632_s12 = smov [#allocation2]   ;;  %s726_s0 = inlined_call_operand.vmem [shape: f32[16,16], index: 0, kind: input, shape index: {}]   ;;  %s727_s1 = inlined_call_operand.hbm [shape: bf16[4,128,128], index: 1, kind: input, shape index: {}]   ;;  %s728_s2 = inlined_call_operand.vmem [shape: f32[4,1,128], index: 2, kind: input, shape index: {}]   ;;  %s729_s3 = inlined_call_operand.vmem [shape: f32[16,128], index: 3, kind: output, shape index: {}]  }
   0x1   :  { %s16_s13 = sshll.u32 %s632_s12, 4  ;;  %s608_s16 = scalar_lea.hbm %s727_s1, 4096  ;;  %s17_s13 = int_to_ptr.vmem [resolvable:$true] %s16_s13 }
   0x2   :  { %p609_p0 = scmp.ne.s32.totalorder %s727_s1, %s608_s16  ;;  %p612_p1 = scmp.lt.u32.totalorder %s608_s16, %s727_s1 }
   0x4   :  { %p614_p2 = pnand %p612_p1, %p609_p0 }
   0x6   :  { %617 = shalt.err (!%p614_p2)
}
   0x7   :  { %s618_s21 = scalar_lea.vmem %s17_s13, 4096  ;;  %p623_p4 = scmp.lt.s32.totalorder %s17_s13, %s17_s13 }
   0x8   :  { %p619_p3 = scmp.ne.s32.totalorder %s17_s13, %s618_s21  ;;  %p624_p5 = scmp.lt.s32.totalorder %s618_s21, %s618_s21 }
   0xa   :  { %p625_p6 = por %p624_p5, %p623_p4 }
   0xc   :  { %p626_p7 = pnand %p625_p6, %p619_p3 }
   0xe   :  { %629 = shalt.err (!%p626_p7)
}
   0xf   :  { %s633_s22 = smov 64   ;;  %s634_s23 = smov 4  }
  0x10   :  { %22 = dma.hbm_to_vmem [thread:$0]  %s727_s1, 4096, %s17_s13, [#allocation3], %s633_s22, %s633_s22, %s634_s23  }
  0x11   :  { %630 = dma.done.wait [#allocation3], 4096  }
  0x12   :  { %631 = vsyncadd [#allocation3], 4294963200  ;;  %v635_v0 = vmov 0.0   ;;  %vm636_vm0 = vmmov 0   ;;  %v583_v1 = vld [vmem:[#allocation2] sm:$0xff]   ;;  %v30_v3 = vld [vmem:[%s726_s0 + $0x8] sm:$0xff] }
  0x13   :  { %512 = vmatprep.subr.bf16.mxu0 %v635_v0  ;;  %514 = vmatprep.mubr.msk.bf16.mxu0 %vm636_vm0, %v635_v0  ;;  %v29_v2 = vld [vmem:[%s726_s0] sm:$0xff]  ;;  %vm47_vm1 = vcmask 130048   ;;  %v585_v6 = vld [vmem:[#allocation2 + $0x48] sm:$0xff]   ;;  %v586_v7 = vld [vmem:[#allocation2 + $0x50] sm:$0xff]  }
  0x14   :  { %518 = vmatprep.subr.bf16.mxu1 %v635_v0  ;;  %534 = vmatprep.mubr.msk.bf16.mxu1 %vm636_vm0, %v635_v0  ;;  %v31_v4 = vpack.c.bf16 %v30_v3, %v29_v2  ;;  %v584_v5 = vld [vmem:[#allocation2 + $0x40] sm:$0xff]   ;;  %v587_v8 = vld [vmem:[#allocation2 + $0x58] sm:$0xff]   ;;  %v589_v10 = vld [vmem:[#allocation2 + $0x68] sm:$0xff]  }
  0x15   :  { %513 = vmatpush3.bf16.msra.mxu0 %v583_v1  ;;  %519 = vmatpush3.bf16.msra.mxu1 %v584_v5  ;;  %v588_v9 = vld [vmem:[#allocation2 + $0x60] sm:$0xff]   ;;  %v590_v11 = vld [vmem:[#allocation2 + $0x70] sm:$0xff]   ;;  %v591_v12 = vld [vmem:[#allocation2 + $0x78] sm:$0xff]  }
  0x16   :  { %538 = vmatprep.subr.bf16.mxu0 %v635_v0  ;;  %520 = vmatprep.subr.bf16.mxu1 %v635_v0  ;;  %v592_v13 = vld [vmem:[#allocation2 + $0x80] sm:$0xff]   ;;  %v593_v14 = vld [vmem:[#allocation2 + $0x88] sm:$0xff]   ;;  %v594_v15 = vld [vmem:[#allocation2 + $0x90] sm:$0xff]  }
  0x17   :  { %v595_v16 = vld [vmem:[#allocation2 + $0x98] sm:$0xff]   ;;  %v596_v17 = vld [vmem:[#allocation2 + $0xa0] sm:$0xff]   ;;  %v597_v18 = vld [vmem:[#allocation2 + $0xa8] sm:$0xff]  }
  0x18   :  { %515 = vmatmul.mubr.msk.bf16.vlgmr.msra.gmra.mrb[0].mxu0 %vm47_vm1, %v31_v4  ;;  %v450_v19 = vld [vmem:[%s728_s2] ss:$0 sm:$0xff]  ;;  %v598_v29 = vld [vmem:[#allocation2 + $0xb0] sm:$0xff]   ;;  %v599_v30 = vld [vmem:[#allocation2 + $0xb8] sm:$0xff]  }
  0x19   :  { %554 = vmatprep.mubr.msk.bf16.mxu0 %vm636_vm0, %v635_v0  ;;  %521 = vmatpush3.bf16.msra.mxu1 %v585_v6  ;;  %v600_v31 = vld [vmem:[#allocation2 + $0xc0] sm:$0xff]   ;;  %v601_v32 = vld [vmem:[#allocation2 + $0xc8] sm:$0xff]   ;;  %v602_v33 = vld [vmem:[#allocation2 + $0xd0] sm:$0xff]  }
  0x1a   :  { %522 = vmatprep.subr.bf16.mxu1 %v635_v0  ;;  %539 = vmatpush3.bf16.msra.mxu0 %v592_v13  ;;  %v603_v34 = vld [vmem:[#allocation2 + $0xd8] sm:$0xff]   ;;  %v604_v35 = vld [vmem:[#allocation2 + $0xe0] sm:$0xff]   ;;  %v605_v36 = vld [vmem:[#allocation2 + $0xe8] sm:$0xff]  }
  0x1b   :  { %540 = vmatprep.subr.bf16.mxu0 %v635_v0  ;;  %v454_v37 = vld [vmem:[%s728_s2 + $0x1] ss:$0 sm:$0xff]  ;;  %v606_v47 = vld [vmem:[#allocation2 + $0xf0] sm:$0xff]   ;;  %v607_v48 = vld [vmem:[#allocation2 + $0xf8] sm:$0xff]  }
  0x1c   :  { %v464_v49 = vld [vmem:[%s728_s2 + $0x2] ss:$0 sm:$0xff]  ;;  %v474_v59 = vld [vmem:[%s728_s2 + $0x3] ss:$0 sm:$0xff] }
  0x1d   :  { %523 = vmatpush3.bf16.msra.mxu1 %v586_v7 }
  0x1e   :  { %524 = vmatprep.subr.bf16.mxu1 %v635_v0  ;;  %541 = vmatpush3.bf16.msra.mxu0 %v593_v14 }
  0x1f   :  { %542 = vmatprep.subr.bf16.mxu0 %v635_v0 }
  0x21   :  { %525 = vmatpush3.bf16.msra.mxu1 %v587_v8 }
  0x22   :  { %526 = vmatprep.subr.bf16.mxu1 %v635_v0  ;;  %543 = vmatpush3.bf16.msra.mxu0 %v594_v15 }
  0x23   :  { %544 = vmatprep.subr.bf16.mxu0 %v635_v0 }
  0x25   :  { %527 = vmatpush3.bf16.msra.mxu1 %v588_v9 }
  0x26   :  { %528 = vmatprep.subr.bf16.mxu1 %v635_v0  ;;  %545 = vmatpush3.bf16.msra.mxu0 %v595_v16 }
  0x27   :  { %546 = vmatprep.subr.bf16.mxu0 %v635_v0 }
  0x29   :  { %529 = vmatpush3.bf16.msra.mxu1 %v589_v10 }
  0x2a   :  { %530 = vmatprep.subr.bf16.mxu1 %v635_v0  ;;  %547 = vmatpush3.bf16.msra.mxu0 %v596_v17 }
  0x2b   :  { %548 = vmatprep.subr.bf16.mxu0 %v635_v0 }
  0x2d   :  { %531 = vmatpush3.bf16.msra.mxu1 %v590_v11 }
  0x2e   :  { %532 = vmatprep.subr.bf16.mxu1 %v635_v0  ;;  %549 = vmatpush3.bf16.msra.mxu0 %v597_v18 }
  0x2f   :  { %550 = vmatprep.subr.bf16.mxu0 %v635_v0 }
  0x31   :  { %533 = vmatpush3.bf16.msra.mxu1 %v591_v12 }
  0x32   :  { %558 = vmatprep.subr.bf16.mxu1 %v635_v0  ;;  %551 = vmatpush3.bf16.msra.mxu0 %v598_v29 }
  0x33   :  { %552 = vmatprep.subr.bf16.mxu0 %v635_v0 }
  0x36   :  { %553 = vmatpush3.bf16.msra.mxu0 %v599_v30 }
  0xeb   :  { %v85_v20 = vpop.f32.mrb[0].mxu0 }
  0xec   :  { %v86_v21 = vadd.f32 %v450_v19, %v85_v20  ;;  %v516_v22 = vpop.f32.mrb[1].mxu0 }
  0xed   :  { %v88_v23 = vpop.f32.mrb[2].mxu0 }
  0xee   :  { %v89_v24 = vadd.f32 %v450_v19, %v88_v23  ;;  %v517_v25 = vpop.f32.mrb[3].mxu0  ;;  %v92_v26 = vmax.f32 %v86_v21, 0.0 }
  0xf0   :  { %v93_v27 = vmax.f32 %v89_v24, 0.0 }
  0xf2   :  { %v94_v28 = vpack.c.bf16 %v93_v27, %v92_v26 }
  0xf4   :  { %535 = vmatmul.mubr.bf16.vlgmr.msra.gmra.mrb[0].mxu1 %v94_v28 }
  0xf5   :  { %574 = vmatprep.mubr.msk.bf16.mxu1 %vm636_vm0, %v635_v0  ;;  %559 = vmatpush3.bf16.msra.mxu1 %v600_v31 }
  0xf6   :  { %560 = vmatprep.subr.bf16.mxu1 %v635_v0 }
  0xf9   :  { %561 = vmatpush3.bf16.msra.mxu1 %v601_v32 }
  0xfa   :  { %562 = vmatprep.subr.bf16.mxu1 %v635_v0 }
  0xfd   :  { %563 = vmatpush3.bf16.msra.mxu1 %v602_v33 }
  0xfe   :  { %564 = vmatprep.subr.bf16.mxu1 %v635_v0 }
 0x101   :  { %565 = vmatpush3.bf16.msra.mxu1 %v603_v34 }
 0x102   :  { %566 = vmatprep.subr.bf16.mxu1 %v635_v0 }
 0x105   :  { %567 = vmatpush3.bf16.msra.mxu1 %v604_v35 }
 0x106   :  { %568 = vmatprep.subr.bf16.mxu1 %v635_v0 }
 0x109   :  { %569 = vmatpush3.bf16.msra.mxu1 %v605_v36 }
 0x10a   :  { %570 = vmatprep.subr.bf16.mxu1 %v635_v0 }
 0x10d   :  { %571 = vmatpush3.bf16.msra.mxu1 %v606_v47 }
 0x10e   :  { %572 = vmatprep.subr.bf16.mxu1 %v635_v0 }
 0x111   :  { %573 = vmatpush3.bf16.msra.mxu1 %v607_v48 }
 0x1c7   :  { %v202_v38 = vpop.f32.mrb[0].mxu1 }
 0x1c8   :  { %v203_v39 = vadd.f32 %v454_v37, %v202_v38  ;;  %v536_v40 = vpop.f32.mrb[1].mxu1 }
 0x1c9   :  { %v205_v41 = vpop.f32.mrb[2].mxu1 }
 0x1ca   :  { %v206_v42 = vadd.f32 %v454_v37, %v205_v41  ;;  %v537_v43 = vpop.f32.mrb[3].mxu1  ;;  %v209_v44 = vmax.f32 %v203_v39, 0.0 }
 0x1cc   :  { %v210_v45 = vmax.f32 %v206_v42, 0.0 }
 0x1ce   :  { %v211_v46 = vpack.c.bf16 %v210_v45, %v209_v44 }
 0x1d0   :  { %555 = vmatmul.mubr.bf16.vlgmr.msra.gmra.mrb[4].mxu0 %v211_v46 }
 0x2a3   :  { %v319_v50 = vpop.f32.mrb[4].mxu0 }
 0x2a4   :  { %v320_v51 = vadd.f32 %v464_v49, %v319_v50  ;;  %v556_v52 = vpop.f32.mrb[5].mxu0 }
 0x2a5   :  { %v322_v53 = vpop.f32.mrb[6].mxu0 }
 0x2a6   :  { %v323_v54 = vadd.f32 %v464_v49, %v322_v53  ;;  %v557_v55 = vpop.f32.mrb[7].mxu0  ;;  %v326_v56 = vmax.f32 %v320_v51, 0.0 }
 0x2a8   :  { %v327_v57 = vmax.f32 %v323_v54, 0.0 }
 0x2aa   :  { %v328_v58 = vpack.c.bf16 %v327_v57, %v326_v56 }
 0x2ac   :  { %575 = vmatmul.mubr.bf16.vlgmr.msra.gmra.mrb[4].mxu1 %v328_v58 }
 0x37f   :  { %v436_v60 = vpop.f32.mrb[4].mxu1 }
 0x380   :  { %v437_v61 = vadd.f32 %v474_v59, %v436_v60  ;;  %v576_v62 = vpop.f32.mrb[5].mxu1 }
 0x381   :  { %v439_v63 = vpop.f32.mrb[6].mxu1 }
 0x382   :  { %443 = vst [vmem:[%s729_s3] sm:$0xff] %v437_v61  ;;  %v440_v0 = vadd.f32 %v474_v59, %v439_v63  ;;  %v577_v1 = vpop.f32.mrb[7].mxu1 }
 0x384   :  { %444 = vst [vmem:[%s729_s3 + $0x8] sm:$0xff] %v440_v0 }
 0x385   :  { %449 = vsyncpa [#allocation3], 1 }

</bundles_post_ra>
